<compile_context>
chip_gen: v7x
topology: tpu7x:2x2x1
jax: 0.10.0
libtpu: 0.0.40
codegen_flags: <defaults>
</compile_context>

<pallas_src>
import functools

import jax
import jax.numpy as jnp
from jax.experimental import pallas as pl
from jax.experimental.pallas import tpu as pltpu


def _round_up(x, m):
    return ((x + m - 1) // m) * m


def _single_pass_kernel(x_ref, w_ref, b_ref, o_ref):
    # Whole (D, tn) weight slab is VMEM-resident: one MXU pass, bias folded in.
    acc = jnp.dot(x_ref[...], w_ref[...], preferred_element_type=jnp.float32)
    o_ref[...] = (acc + b_ref[...].astype(jnp.float32)).astype(o_ref.dtype)


def _tiled_linear_kernel(x_ref, w_ref, b_ref, o_ref, *scratch, tk, d, acc_in_out):
    # x_ref: (tm, tk), w_ref: (tk, tn) [W^T layout], b_ref: (1, tn), o_ref: (tm, tn).
    # acc_in_out: accumulate directly in the resident f32 output block (no scratch).
    acc_ref = o_ref if acc_in_out else scratch[0]
    k = pl.program_id(2)

    @pl.when(k == 0)
    def _init():
        # Fold bias into the accumulator init (one broadcast per output tile).
        acc_ref[...] = jnp.broadcast_to(
            b_ref[...].astype(jnp.float32), acc_ref.shape
        )

    x = x_ref[...]
    if d % tk != 0:
        # Ragged contraction tail: zero the out-of-range K columns of x so
        # garbage in the edge block can never reach the accumulator.
        col = jax.lax.broadcasted_iota(jnp.int32, x_ref.shape, 1)
        x = jnp.where(k * tk + col < d, x, jnp.zeros_like(x))

    acc_ref[...] += jnp.dot(x, w_ref[...], preferred_element_type=jnp.float32)

    if not acc_in_out:
        @pl.when(k == pl.num_programs(2) - 1)
        def _finalize():
            o_ref[...] = acc_ref[...].astype(o_ref.dtype)


def logistic_regression_forward(
    x,
    weight,
    bias,
    *,
    tm=512,
    tn=None,
    tk=None,
    compute_dtype=None,
    allow_single_pass=True,
):
    """Computes x @ weight.T + bias (nn.Linear semantics).

    x: (B, D), weight: (O, D) (PyTorch layout), bias: (O,).
    compute_dtype: optional dtype for the matmul operands (e.g. jnp.bfloat16);
      accumulation is always f32 and the output keeps x.dtype.
    """
    B, D = x.shape
    O, D2 = weight.shape
    assert D == D2 and bias.shape == (O,)
    out_dtype = x.dtype

    # VMEM budget: 3/4 of physical capacity, capped at 96 MiB (v5e/v6e: 128 MiB
    # -> 96 MiB; v7x: 64 MiB -> 48 MiB).  Fallback if the query is unavailable.
    try:
        vmem_cap = int(pltpu.get_tpu_info().vmem_capacity_bytes)
    except Exception:
        vmem_cap = 64 * 1024 * 1024
    vmem_limit = int(min((vmem_cap * 3) // 4, 96 * 1024 * 1024))
    budget = (vmem_limit * 4) // 5

    # Lay out the (small) weight as (D, O) once so the MXU contracts directly
    # with a lane-dense RHS (no in-kernel transpose).
    wt = weight.T
    if compute_dtype is not None and compute_dtype != x.dtype:
        x_in = x.astype(compute_dtype)
        wt = wt.astype(compute_dtype)
    else:
        x_in = x
    b2d = bias.reshape(1, O).astype(jnp.float32)

    in_bytes = x_in.dtype.itemsize
    out_bytes = jnp.dtype(out_dtype).itemsize

    # ---- tile selection --------------------------------------------------
    # tn: whole O as one lane block when small (typical logistic regression),
    # else a lane-aligned 512.  tm: multiple of 8, never larger than needed.
    if tn is None:
        tn = O if O <= 512 else 512
    tm = _round_up(min(tm, _round_up(B, 8)), 8)
    # v7x megacore: guarantee >=2 independent blocks on the parallel axes so
    # both TensorCores get work (no effect on single-TC v5e/v6e).
    if B >= 16 and pl.cdiv(B, tm) * pl.cdiv(O, tn) < 2:
        tm = max(8, _round_up(pl.cdiv(B, 2), 8))

    # ---- path A: single K pass (whole W^T resident in VMEM) ---------------
    single_pass_bytes = 2 * (
        tm * D * in_bytes + D * tn * in_bytes + tn * 4 + tm * tn * out_bytes
    )
    if allow_single_pass and tk is None and single_pass_bytes <= budget:
        grid = (pl.cdiv(B, tm), pl.cdiv(O, tn))
        return pl.pallas_call(
            _single_pass_kernel,
            out_shape=jax.ShapeDtypeStruct((B, O), out_dtype),
            grid=grid,
            in_specs=[
                pl.BlockSpec((tm, D), lambda i, j: (i, 0)),   # x tile
                pl.BlockSpec((D, tn), lambda i, j: (0, j)),   # W^T slab
                pl.BlockSpec((1, tn), lambda i, j: (0, j)),   # bias
            ],
            out_specs=pl.BlockSpec((tm, tn), lambda i, j: (i, j)),
            compiler_params=pltpu.CompilerParams(
                dimension_semantics=("parallel", "parallel"),
                vmem_limit_bytes=vmem_limit,
            ),
        )(x_in, wt, b2d)

    # ---- path B: tiled (M, N, K) grid with f32 accumulation ---------------
    if tk is None:
        tk = min(2048 if in_bytes <= 2 else 1024, _round_up(D, 128))
    grid_k = pl.cdiv(D, tk)
    # Zero-pad only the small W^T operand along K so the ragged contraction
    # tail multiplies against exact zeros (x's tail is masked in-kernel).
    kp = grid_k * tk
    if kp != wt.shape[0]:
        wt = jnp.pad(wt, ((0, kp - wt.shape[0]), (0, 0)))

    acc_in_out = out_dtype == jnp.float32
    kernel = functools.partial(
        _tiled_linear_kernel, tk=tk, d=D, acc_in_out=acc_in_out
    )
    scratch = [] if acc_in_out else [pltpu.VMEM((tm, tn), jnp.float32)]

    return pl.pallas_call(
        kernel,
        out_shape=jax.ShapeDtypeStruct((B, O), out_dtype),
        grid=(pl.cdiv(B, tm), pl.cdiv(O, tn), grid_k),
        in_specs=[
            pl.BlockSpec((tm, tk), lambda i, j, k: (i, k)),   # x tile
            pl.BlockSpec((tk, tn), lambda i, j, k: (k, j)),   # W^T tile
            pl.BlockSpec((1, tn), lambda i, j, k: (0, j)),    # bias tile
        ],
        out_specs=pl.BlockSpec((tm, tn), lambda i, j, k: (i, j)),
        scratch_shapes=scratch,
        compiler_params=pltpu.CompilerParams(
            dimension_semantics=("parallel", "parallel", "arbitrary"),
            vmem_limit_bytes=vmem_limit,
        ),
    )(x_in, wt, b2d)


if __name__ == "__main__":
    key = jax.random.PRNGKey(0)
    kx, kw, kb = jax.random.split(key, 3)

    # Shapes implied by the module: Logistic_Regression(input_dim, output_dim).
    batch, input_dim, output_dim = 8, 32, 16
    x = jax.random.normal(kx, (batch, input_dim), dtype=jnp.float32)
    bound = 1.0 / (input_dim ** 0.5)
    weight = jax.random.uniform(
        kw, (output_dim, input_dim), minval=-bound, maxval=bound, dtype=jnp.float32
    )
    bias = jax.random.uniform(
        kb, (output_dim,), minval=-bound, maxval=bound, dtype=jnp.float32
    )

    out = logistic_regression_forward(x, weight, bias)
    jax.block_until_ready(out)
    ref = x @ weight.T + bias
    assert out.shape == (batch, output_dim)
    assert jnp.allclose(out, ref, atol=1e-5, rtol=1e-5)

    # Unaligned shapes: exercises masked edge blocks (no wrapper pad / slice).
    B1, D1, O1 = 37, 45, 7
    k1, k2, k3 = jax.random.split(jax.random.PRNGKey(1), 3)
    x1 = jax.random.normal(k1, (B1, D1), dtype=jnp.float32)
    w1 = jax.random.normal(k2, (O1, D1), dtype=jnp.float32) * 0.1
    b1 = jax.random.normal(k3, (O1,), dtype=jnp.float32)
    o1 = logistic_regression_forward(x1, w1, b1)
    jax.block_until_ready(o1)
    assert jnp.allclose(o1, x1 @ w1.T + b1, atol=1e-4, rtol=1e-4)

    # Larger shape forced onto the tiled (M, N, K) path with a ragged K tail
    # and partial M/N edge tiles (exercises acc-in-output + K-tail masking).
    B2, D2, O2 = 500, 1000, 400
    k4, k5, k6 = jax.random.split(jax.random.PRNGKey(2), 3)
    x2 = jax.random.normal(k4, (B2, D2), dtype=jnp.float32)
    w2 = jax.random.normal(k5, (O2, D2), dtype=jnp.float32) * 0.02
    b2 = jax.random.normal(k6, (O2,), dtype=jnp.float32)
    o2 = logistic_regression_forward(
        x2, w2, b2, tm=128, tn=128, tk=256, allow_single_pass=False
    )
    jax.block_until_ready(o2)
    ref2 = x2 @ w2.T + b2
    assert jnp.allclose(o2, ref2, atol=1e-3, rtol=1e-3)

    # bf16 compute with f32 accumulation (bandwidth-optimal configuration).
    o3 = logistic_regression_forward(x2, w2, b2, compute_dtype=jnp.bfloat16)
    jax.block_until_ready(o3)
    assert o3.dtype == x2.dtype
    assert jnp.allclose(o3, ref2, atol=5e-2, rtol=5e-2)

    print("KERNEL_OK")
</pallas_src>

<mosaic_0001>
module attributes {stable_mosaic.version = 11 : i64} {
  func.func @_single_pass_kernel(%arg0: i32, %arg1: i32, %arg2: memref<8x32xf32, #tpu.memory_space<vmem>>, %arg3: memref<32x16xf32, #tpu.memory_space<vmem>>, %arg4: memref<1x16xf32, #tpu.memory_space<vmem>>, %arg5: memref<8x16xf32, #tpu.memory_space<vmem>>) attributes {dimension_semantics = [#tpu.dimension_semantics<parallel>, #tpu.dimension_semantics<parallel>], iteration_bounds = array<i64: 1, 1>, scalar_prefetch = 0 : i64, scratch_operands = 0 : i64, tpu.core_type = #tpu.core_type<tc>, window_params = [{transform_indices = @transform_0, window_bounds = array<i64: 8, 32>}, {transform_indices = @transform_1, window_bounds = array<i64: 32, 16>}, {transform_indices = @transform_2, window_bounds = array<i64: 1, 16>}, {transform_indices = @transform_3, window_bounds = array<i64: 8, 16>}]} {
    %c0 = arith.constant 0 : index
    %c0_0 = arith.constant 0 : index
    %0 = vector.load %arg2[%c0, %c0_0] : memref<8x32xf32, #tpu.memory_space<vmem>>, vector<8x32xf32>
    %c0_1 = arith.constant 0 : index
    %c0_2 = arith.constant 0 : index
    %1 = vector.load %arg3[%c0_1, %c0_2] : memref<32x16xf32, #tpu.memory_space<vmem>>, vector<32x16xf32>
    %cst = arith.constant dense<0.000000e+00> : vector<8x16xf32>
    %2 = tpu.matmul %0, %1, %cst {dimension_numbers = #tpu.dot_dimension_numbers<[1], [0], [0], [1], [0, 0, 1, 1], [], []>} : vector<8x32xf32>, vector<32x16xf32>, vector<8x16xf32> -> vector<8x16xf32>
    %c0_3 = arith.constant 0 : index
    %c0_4 = arith.constant 0 : index
    %3 = vector.load %arg4[%c0_3, %c0_4] : memref<1x16xf32, #tpu.memory_space<vmem>>, vector<1x16xf32>
    %4 = vector.broadcast %3 : vector<1x16xf32> to vector<8x16xf32>
    %5 = arith.addf %2, %4 : vector<8x16xf32>
    %c0_5 = arith.constant 0 : index
    %c0_6 = arith.constant 0 : index
    %6 = vector.load %arg5[%c0_5, %c0_6] : memref<8x16xf32, #tpu.memory_space<vmem>>, vector<8x16xf32>
    tpu.vector_store %arg5[%c0_5, %c0_6], %5 {strides = array<i32>} : memref<8x16xf32, #tpu.memory_space<vmem>>, vector<8x16xf32>,
    return
  }
  func.func @transform_0(%arg0: i32, %arg1: i32) -> (i32, i32) {
    %c0_i32 = arith.constant 0 : i32
    %c0_i32_0 = arith.constant 0 : i32
    return %arg0, %c0_i32 : i32, i32
  }
  func.func @transform_1(%arg0: i32, %arg1: i32) -> (i32, i32) {
    %c0_i32 = arith.constant 0 : i32
    %c0_i32_0 = arith.constant 0 : i32
    return %c0_i32, %arg1 : i32, i32
  }
  func.func @transform_2(%arg0: i32, %arg1: i32) -> (i32, i32) {
    %c0_i32 = arith.constant 0 : i32
    %c0_i32_0 = arith.constant 0 : i32
    return %c0_i32, %arg1 : i32, i32
  }
  func.func @transform_3(%arg0: i32, %arg1: i32) -> (i32, i32) {
    %c0_i32 = arith.constant 0 : i32
    return %arg0, %arg1 : i32, i32
  }
}

</mosaic_0001>

<bundles_post_ra>
// kernel: tpu_custom_call.1
= control target key start
LH: loop header
LB: loop body
LE: loop exit
PB: predicated region body
PF: predicated region fallthrough
CT: control target
= control target key end

     0   :  { %v169_v3 = vmov 0.0|0.0   ;;  %vm170_vm0 = vmmov 0   ;;  %v171_v6 = vmov 0.0   ;;  %s223_s0 = inlined_call_operand.vmem [shape: f32[8,32], index: 0, kind: input, shape index: {}]   ;;  %s224_s1 = inlined_call_operand.vmem [shape: f32[32,16], index: 1, kind: input, shape index: {}]   ;;  %s225_s2 = inlined_call_operand.vmem [shape: f32[1,16], index: 2, kind: input, shape index: {}]   ;;  %s226_s3 = inlined_call_operand.hbm [shape: f32[8,16], index: 3, kind: output, shape index: {}]  }
   0x1   :  { %v16_v0 = vld [vmem:[%s224_s1] sm:$0xff]  ;;  %v17_v1 = vld [vmem:[%s224_s1 + $0x8] sm:$0xff]  ;;  %v18_v2 = vld [vmem:[%s224_s1 + $0x10] sm:$0xff]  ;;  %135 = vmatprep.subr.bf16.mxu0 %v169_v3  ;;  %132 = vmatprep.mubr.msk.f32.mxu0 %vm170_vm0, %v171_v6 }
   0x2   :  { %v136_v4 = vpack.c.bf16 %v17_v1, %v16_v0  ;;  %v19_v5 = vld [vmem:[%s224_s1 + $0x18] sm:$0xff] }
   0x3   :  { %8 = vsyncpa [#allocation3], 0  ;;  %v139_v7 = vpack.c.bf16 %v19_v5, %v18_v2  ;;  %v15_v8 = vld [vmem:[%s223_s0] sm:$0xff]  ;;  %vm27_vm1 = vcmask 261120   ;;  %s172_s24 = smov [#allocation2]   ;;  %vm101_vm2 = vcmask 130048  }
   0x4   :  { %137 = vmatpush3.bf16.msra.mxu0 %v136_v4  ;;  %v117_v9 = vld [vmem:[%s225_s2] ss:$0 sm:$0xff]  ;;  %s109_s1 = sshll.u32 %s172_s24, 4  ;;  %s110_s1 = int_to_ptr.vmem [resolvable:$true] %s109_s1 }
   0x5   :  { %138 = vmatprep.subr.bf16.mxu0 %v169_v3  ;;  %s145_s25 = scalar_lea.vmem %s110_s1, 128  ;;  %p150_p1 = scmp.lt.s32.totalorder %s110_s1, %s110_s1 }
   0x6   :  { %p146_p0 = scmp.ne.s32.totalorder %s110_s1, %s145_s25  ;;  %p151_p2 = scmp.lt.s32.totalorder %s145_s25, %s145_s25 }
   0x8   :  { %140 = vmatpush3.bf16.msra.mxu0 %v139_v7  ;;  %p152_p3 = por %p151_p2, %p150_p1 }
   0xa   :  { %p153_p4 = pnand %p152_p3, %p146_p0 }
   0xb   :  { %133 = vmatmul.mubr.msk.f32.vlgmr.msra.gmra.mrb[0].mxu0 %vm27_vm1, %v15_v8 }
  0xde   :  { %v97_v10 = vpop.f32.mrb[0].mxu0 }
  0xdf   :  { %v98_v11 = vadd.f32 %v117_v9, %v97_v10  ;;  %v134_v12 = vpop.f32.mrb[1].mxu0 }
  0xe1   :  { %102 = vst.msk [vmem:[#allocation2] sm:$0xff] %vm101_vm2, %v98_v11 }
  0xe2   :  { %156 = shalt.err (!%p153_p4)
}
  0xe3   :  { %s157_s27 = scalar_lea.hbm %s226_s3, 128 }
  0xe4   :  { %p158_p5 = scmp.ne.s32.totalorder %s226_s3, %s157_s27  ;;  %p161_p6 = scmp.lt.u32.totalorder %s157_s27, %s226_s3 }
  0xe6   :  { %p163_p7 = pnand %p161_p6, %p158_p5 }
  0xe8   :  { %166 = shalt.err (!%p163_p7)
}
  0xe9   :  { %112 = dma.vmem_to_hbm [thread:$0]  %s110_s1, 128, %s226_s3, [#allocation3]  }
  0xea   :  { %167 = dma.done.wait [#allocation3], 128  }
  0xeb   :  { %168 = vsyncadd [#allocation3], 4294967168 }
  0xec   :  { %116 = vsyncpa [#allocation3], 1 }

</bundles_post_ra>
